<compile_context>
chip_gen: v7x
topology: tpu7x:2x2x1
jax: 0.10.0
libtpu: 0.0.40
codegen_flags: <defaults>
</compile_context>

<pallas_src>
import functools

import jax
import jax.numpy as jnp
from jax.experimental import pallas as pl
from jax.experimental.pallas import tpu as pltpu


def _focal_loss_kernel(pred_ref, target_ref, alpha_ref, pw_ref, out_ref,
                       *, gamma, n_valid):
    tile_r, lanes = pred_ref.shape

    x = pred_ref[...].astype(jnp.float32)      # (TILE_R, L)
    t = target_ref[...].astype(jnp.float32)    # (TILE_R, L)
    alpha = alpha_ref[...]                     # (1, L) -> broadcasts over rows
    pw = pw_ref[...]                           # (1, L) -> broadcasts over rows

    # One shared EUP exp: e = exp(-|x|) drives both sigmoid and softplus(-x).
    e = jnp.exp(-jnp.abs(x))
    inv_1pe = 1.0 / (1.0 + e)
    sig = jnp.where(x >= 0.0, inv_1pe, e * inv_1pe)          # sigmoid(x)
    softplus_neg_x = jnp.maximum(-x, 0.0) + jnp.log1p(e)     # softplus(-x)

    # focal weight (gamma specialized at trace time)
    pt = (1.0 - sig + 1e-8) * t + (sig + 1e-8) * (1.0 - t)
    if gamma == 2.0:
        ptg = pt * pt
    elif float(gamma).is_integer() and gamma >= 1.0:
        ptg = pt
        for _ in range(int(gamma) - 1):
            ptg = ptg * pt
    else:
        ptg = pt ** gamma
    focal_w = ptg * alpha

    # numerically stable binary_cross_entropy_with_logits with pos_weight:
    #   l = (1 - t) * x + (1 + (pw - 1) * t) * softplus(-x)
    log_weight = 1.0 + (pw - 1.0) * t
    bce = (1.0 - t) * x + log_weight * softplus_neg_x

    loss = focal_w * bce

    # Mask padded elements (flat row-major index >= n_valid).  Cheap VPU work
    # that hides under the EUP exp/log1p.
    row0 = pl.program_id(0) * tile_r
    rid = jax.lax.broadcasted_iota(jnp.int32, (tile_r, lanes), 0) + row0
    lid = jax.lax.broadcasted_iota(jnp.int32, (tile_r, lanes), 1)
    flat_idx = rid * lanes + lid
    loss = jnp.where(flat_idx < n_valid, loss, 0.0)

    # Per-tile (8, L) partial sums: vreg-wise adds only (VPU); the final
    # cross-lane/sublane reduction happens once in the wrapper.
    out_ref[...] = loss.reshape(tile_r // 8, 8, lanes).sum(axis=0)


def focal_loss(pred, target, alpha, pos_weight,
               gamma=2.0, reduction="mean", loss_weight=1.0):
    assert reduction == "mean", "only the default reduction='mean' is implemented"
    B, C = pred.shape
    n_real = B * C

    # --- glue: per-class alpha / pos_weight row vectors -------------------
    alpha_vec = jnp.asarray(alpha, jnp.float32).reshape(-1)
    if alpha_vec.shape[0] == 1:
        alpha_vec = jnp.broadcast_to(alpha_vec, (C,))
    assert alpha_vec.shape[0] == C, "alpha must have one weight per class (or be scalar)"
    pw_vec = jnp.asarray(pos_weight, jnp.float32).reshape(-1)
    if pw_vec.shape[0] == 1:
        pw_vec = jnp.broadcast_to(pw_vec, (C,))
    assert pw_vec.shape[0] == C, "pos_weight must have one weight per class (or be scalar)"

    # --- lane-dense layout -------------------------------------------------
    if 128 % C == 0:
        # Flatten row-major: class of lane l is (l % C) because C | 128.
        L = 128
        reps = L // C
        alpha_row = jnp.tile(alpha_vec, reps).reshape(1, L)
        pw_row = jnp.tile(pw_vec, reps).reshape(1, L)
        flat_p = pred.reshape(-1)
        flat_t = target.reshape(-1)
        n_valid = n_real
    else:
        # Pad the class axis to a multiple of 128; padded classes get
        # alpha = 0 so they contribute exactly zero loss.
        C_pad = ((C + 127) // 128) * 128
        L = C_pad
        pad_c = C_pad - C
        alpha_row = jnp.pad(alpha_vec, (0, pad_c)).reshape(1, L)
        pw_row = jnp.pad(pw_vec, (0, pad_c), constant_values=1.0).reshape(1, L)
        flat_p = jnp.pad(pred, ((0, 0), (0, pad_c))).reshape(-1)
        flat_t = jnp.pad(target, ((0, 0), (0, pad_c))).reshape(-1)
        n_valid = B * C_pad

    # --- row tiling ----------------------------------------------------------
    rows = -(-flat_p.shape[0] // L)                       # cdiv
    TILE_R = 512 if rows >= 512 else max(8, ((rows + 7) // 8) * 8)
    num_tiles = -(-rows // TILE_R)
    rows_padded = num_tiles * TILE_R
    pad_e = rows_padded * L - flat_p.shape[0]
    if pad_e:
        flat_p = jnp.pad(flat_p, (0, pad_e))
        flat_t = jnp.pad(flat_t, (0, pad_e))
    pred2d = flat_p.reshape(rows_padded, L)
    target2d = flat_t.reshape(rows_padded, L)

    kernel = functools.partial(
        _focal_loss_kernel,
        gamma=float(gamma),
        n_valid=int(n_valid),
    )

    partials = pl.pallas_call(
        kernel,
        out_shape=jax.ShapeDtypeStruct((num_tiles * 8, L), jnp.float32),
        grid=(num_tiles,),
        in_specs=[
            pl.BlockSpec((TILE_R, L), lambda i: (i, 0)),   # pred
            pl.BlockSpec((TILE_R, L), lambda i: (i, 0)),   # target
            pl.BlockSpec((1, L), lambda i: (0, 0)),        # alpha (lane row)
            pl.BlockSpec((1, L), lambda i: (0, 0)),        # pos_weight (lane row)
        ],
        out_specs=pl.BlockSpec((8, L), lambda i: (i, 0)),  # per-tile partial sums
        compiler_params=pltpu.CompilerParams(
            dimension_semantics=("parallel",)),
    )(pred2d, target2d, alpha_row, pw_row)

    # Tiny final reduction + mean/loss_weight scale in plain JAX.
    return jnp.sum(partials) * (float(loss_weight) / float(n_real))


def focal_loss_ref(pred, target, alpha, pos_weight, gamma=2.0, loss_weight=1.0):
    """Pure-JAX reference mirroring the PyTorch forward."""
    C = pred.shape[1]
    alpha = jnp.broadcast_to(jnp.asarray(alpha, jnp.float32).reshape(1, -1), (1, C))
    pw = jnp.broadcast_to(jnp.asarray(pos_weight, jnp.float32).reshape(1, -1), (1, C))
    sig = jax.nn.sigmoid(pred)
    pt = (1.0 - sig + 1e-8) * target + (sig + 1e-8) * (1.0 - target)
    fw = (pt ** gamma) * alpha
    log_weight = 1.0 + (pw - 1.0) * target
    softplus_neg_x = jnp.maximum(-pred, 0.0) + jnp.log1p(jnp.exp(-jnp.abs(pred)))
    bce = (1.0 - target) * pred + log_weight * softplus_neg_x
    return jnp.mean(fw * bce) * loss_weight


if __name__ == "__main__":
    key = jax.random.PRNGKey(0)

    # --- case 1: lane-dense flatten path (C divides 128) -------------------
    B, C = 32, 8
    k_pred, k_tgt, key = jax.random.split(key, 3)
    pred = jax.random.normal(k_pred, (B, C), dtype=jnp.float32)
    target = jax.random.bernoulli(k_tgt, 0.3, (B, C)).astype(jnp.float32)
    alpha = jnp.linspace(0.1, 0.9, C, dtype=jnp.float32)   # per-class alpha
    pos_weight = jnp.array([1.0], dtype=jnp.float32)       # module default buffer

    out = focal_loss(pred, target, alpha, pos_weight,
                     gamma=2.0, reduction="mean", loss_weight=1.0)
    out = jax.block_until_ready(out)
    ref = focal_loss_ref(pred, target, alpha, pos_weight)
    assert jnp.allclose(out, ref, rtol=1e-5, atol=1e-6), (out, ref)

    # --- case 2: padded-class fallback path (128 % C != 0) -----------------
    B2, C2 = 16, 12
    k_pred2, k_tgt2, key = jax.random.split(key, 3)
    pred2 = jax.random.normal(k_pred2, (B2, C2), dtype=jnp.float32)
    target2 = jax.random.bernoulli(k_tgt2, 0.3, (B2, C2)).astype(jnp.float32)
    alpha2 = 0.25                                           # scalar alpha branch
    pos_weight2 = jnp.full((C2,), 1.5, dtype=jnp.float32)   # per-class pos_weight

    out2 = focal_loss(pred2, target2, alpha2, pos_weight2,
                      gamma=2.0, reduction="mean", loss_weight=2.0)
    out2 = jax.block_until_ready(out2)
    ref2 = focal_loss_ref(pred2, target2, alpha2, pos_weight2, loss_weight=2.0)
    assert jnp.allclose(out2, ref2, rtol=1e-5, atol=1e-6), (out2, ref2)

    print("KERNEL_OK")
</pallas_src>

<mosaic_0001>
module attributes {stable_mosaic.version = 11 : i64} {
  func.func @_focal_loss_kernel(%arg0: i32, %arg1: memref<8x128xf32, #tpu.memory_space<vmem>>, %arg2: memref<8x128xf32, #tpu.memory_space<vmem>>, %arg3: memref<1x128xf32, #tpu.memory_space<vmem>>, %arg4: memref<1x128xf32, #tpu.memory_space<vmem>>, %arg5: memref<8x128xf32, #tpu.memory_space<vmem>>) attributes {dimension_semantics = [#tpu.dimension_semantics<parallel>], iteration_bounds = array<i64: 1>, scalar_prefetch = 0 : i64, scratch_operands = 0 : i64, tpu.core_type = #tpu.core_type<tc>, window_params = [{transform_indices = @transform_0, window_bounds = array<i64: 8, 128>}, {transform_indices = @transform_1, window_bounds = array<i64: 8, 128>}, {pipeline_mode = #tpu.pipeline_mode<synchronous>, transform_indices = @transform_2, window_bounds = array<i64: 1, 128>}, {pipeline_mode = #tpu.pipeline_mode<synchronous>, transform_indices = @transform_3, window_bounds = array<i64: 1, 128>}, {transform_indices = @transform_4, window_bounds = array<i64: 8, 128>}]} {
    %c0 = arith.constant 0 : index
    %c0_0 = arith.constant 0 : index
    %0 = vector.load %arg1[%c0, %c0_0] : memref<8x128xf32, #tpu.memory_space<vmem>>, vector<8x128xf32>
    %c0_1 = arith.constant 0 : index
    %c0_2 = arith.constant 0 : index
    %1 = vector.load %arg2[%c0_1, %c0_2] : memref<8x128xf32, #tpu.memory_space<vmem>>, vector<8x128xf32>
    %c0_3 = arith.constant 0 : index
    %c0_4 = arith.constant 0 : index
    %2 = vector.load %arg3[%c0_3, %c0_4] : memref<1x128xf32, #tpu.memory_space<vmem>>, vector<1x128xf32>
    %c0_5 = arith.constant 0 : index
    %c0_6 = arith.constant 0 : index
    %3 = vector.load %arg4[%c0_5, %c0_6] : memref<1x128xf32, #tpu.memory_space<vmem>>, vector<1x128xf32>
    %4 = math.absf %0 : vector<8x128xf32>
    %cst = arith.constant 0.000000e+00 : f32
    %5 = vector.broadcast %cst : f32 to vector<8x128xf32>
    %6 = arith.subf %5, %4 : vector<8x128xf32>
    %7 = math.exp %6 : vector<8x128xf32>
    %cst_7 = arith.constant 1.000000e+00 : f32
    %8 = vector.broadcast %cst_7 : f32 to vector<8x128xf32>
    %9 = arith.addf %8, %7 : vector<8x128xf32>
    %cst_8 = arith.constant 1.000000e+00 : f32
    %10 = vector.broadcast %cst_8 : f32 to vector<8x128xf32>
    %11 = arith.divf %10, %9 : vector<8x128xf32>
    %cst_9 = arith.constant 0.000000e+00 : f32
    %12 = vector.broadcast %cst_9 : f32 to vector<8x128xf32>
    %13 = arith.cmpf oge, %0, %12 : vector<8x128xf32>
    %14 = arith.mulf %7, %11 : vector<8x128xf32>
    %15 = arith.select %13, %11, %14 : vector<8x128xi1>, vector<8x128xf32>
    %cst_10 = arith.constant 0.000000e+00 : f32
    %16 = vector.broadcast %cst_10 : f32 to vector<8x128xf32>
    %17 = arith.subf %16, %0 : vector<8x128xf32>
    %cst_11 = arith.constant 0.000000e+00 : f32
    %18 = vector.broadcast %cst_11 : f32 to vector<8x128xf32>
    %19 = arith.maximumf %17, %18 : vector<8x128xf32>
    %20 = math.log1p %7 : vector<8x128xf32>
    %21 = arith.addf %19, %20 : vector<8x128xf32>
    %cst_12 = arith.constant 1.000000e+00 : f32
    %22 = vector.broadcast %cst_12 : f32 to vector<8x128xf32>
    %23 = arith.subf %22, %15 : vector<8x128xf32>
    %cst_13 = arith.constant 9.99999993E-9 : f32
    %24 = vector.broadcast %cst_13 : f32 to vector<8x128xf32>
    %25 = arith.addf %23, %24 : vector<8x128xf32>
    %26 = arith.mulf %25, %1 : vector<8x128xf32>
    %cst_14 = arith.constant 9.99999993E-9 : f32
    %27 = vector.broadcast %cst_14 : f32 to vector<8x128xf32>
    %28 = arith.addf %15, %27 : vector<8x128xf32>
    %cst_15 = arith.constant 1.000000e+00 : f32
    %29 = vector.broadcast %cst_15 : f32 to vector<8x128xf32>
    %30 = arith.subf %29, %1 : vector<8x128xf32>
    %31 = arith.mulf %28, %30 : vector<8x128xf32>
    %32 = arith.addf %26, %31 : vector<8x128xf32>
    %33 = arith.mulf %32, %32 : vector<8x128xf32>
    %34 = vector.broadcast %2 : vector<1x128xf32> to vector<8x128xf32>
    %35 = arith.mulf %33, %34 : vector<8x128xf32>
    %cst_16 = arith.constant 1.000000e+00 : f32
    %36 = vector.broadcast %cst_16 : f32 to vector<1x128xf32>
    %37 = arith.subf %3, %36 : vector<1x128xf32>
    %38 = vector.broadcast %37 : vector<1x128xf32> to vector<8x128xf32>
    %39 = arith.mulf %38, %1 : vector<8x128xf32>
    %cst_17 = arith.constant 1.000000e+00 : f32
    %40 = vector.broadcast %cst_17 : f32 to vector<8x128xf32>
    %41 = arith.addf %40, %39 : vector<8x128xf32>
    %cst_18 = arith.constant 1.000000e+00 : f32
    %42 = vector.broadcast %cst_18 : f32 to vector<8x128xf32>
    %43 = arith.subf %42, %1 : vector<8x128xf32>
    %44 = arith.mulf %43, %0 : vector<8x128xf32>
    %45 = arith.mulf %41, %21 : vector<8x128xf32>
    %46 = arith.addf %44, %45 : vector<8x128xf32>
    %47 = arith.mulf %35, %46 : vector<8x128xf32>
    %c8_i32 = arith.constant 8 : i32
    %48 = arith.muli %arg0, %c8_i32 : i32
    %49 = tpu.iota {dimensions = array<i32: 0>} : vector<8x128xi32>
    %50 = vector.broadcast %48 : i32 to vector<8x128xi32>
    %51 = arith.addi %49, %50 : vector<8x128xi32>
    %52 = tpu.iota {dimensions = array<i32: 1>} : vector<8x128xi32>
    %c128_i32 = arith.constant 128 : i32
    %53 = vector.broadcast %c128_i32 : i32 to vector<8x128xi32>
    %54 = arith.muli %51, %53 : vector<8x128xi32>
    %55 = arith.addi %54, %52 : vector<8x128xi32>
    %c256_i32 = arith.constant 256 : i32
    %56 = vector.broadcast %c256_i32 : i32 to vector<8x128xi32>
    %57 = arith.cmpi slt, %55, %56 : vector<8x128xi32>
    %cst_19 = arith.constant 0.000000e+00 : f32
    %58 = vector.broadcast %cst_19 : f32 to vector<8x128xf32>
    %59 = arith.select %57, %47, %58 : vector<8x128xi1>, vector<8x128xf32>
    %60 = vector.shape_cast %59 : vector<8x128xf32> to vector<1x8x128xf32>
    %cst_20 = arith.constant dense<0.000000e+00> : vector<8x128xf32>
    %61 = vector.multi_reduction <add>, %60, %cst_20 [0] : vector<1x8x128xf32> to vector<8x128xf32>
    %c0_21 = arith.constant 0 : index
    %c0_22 = arith.constant 0 : index
    %62 = vector.load %arg5[%c0_21, %c0_22] : memref<8x128xf32, #tpu.memory_space<vmem>>, vector<8x128xf32>
    tpu.vector_store %arg5[%c0_21, %c0_22], %61 {strides = array<i32>} : memref<8x128xf32, #tpu.memory_space<vmem>>, vector<8x128xf32>,
    return
  }
  func.func @transform_0(%arg0: i32) -> (i32, i32) {
    %c0_i32 = arith.constant 0 : i32
    %c0_i32_0 = arith.constant 0 : i32
    return %arg0, %c0_i32 : i32, i32
  }
  func.func @transform_1(%arg0: i32) -> (i32, i32) {
    %c0_i32 = arith.constant 0 : i32
    %c0_i32_0 = arith.constant 0 : i32
    return %arg0, %c0_i32 : i32, i32
  }
  func.func @transform_2(%arg0: i32) -> (i32, i32) {
    %c0_i32 = arith.constant 0 : i32
    %c0_i32_0 = arith.constant 0 : i32
    %c0_i32_1 = arith.constant 0 : i32
    return %c0_i32, %c0_i32_0 : i32, i32
  }
  func.func @transform_3(%arg0: i32) -> (i32, i32) {
    %c0_i32 = arith.constant 0 : i32
    %c0_i32_0 = arith.constant 0 : i32
    %c0_i32_1 = arith.constant 0 : i32
    return %c0_i32, %c0_i32_0 : i32, i32
  }
  func.func @transform_4(%arg0: i32) -> (i32, i32) {
    %c0_i32 = arith.constant 0 : i32
    %c0_i32_0 = arith.constant 0 : i32
    return %arg0, %c0_i32 : i32, i32
  }
}

</mosaic_0001>

<bundles_post_ra>
// kernel: tpu_custom_call.1
= control target key start
LH: loop header
LB: loop body
LE: loop exit
PB: predicated region body
PF: predicated region fallthrough
CT: control target
= control target key end

     0   :  { %9 = vsyncpa [#allocation3], 0  ;;  %s278_s0 = inlined_call_operand.hbm [shape: f32[8,128], index: 0, kind: input, shape index: {}]   ;;  %s279_s1 = inlined_call_operand.hbm [shape: f32[8,128], index: 1, kind: input, shape index: {}]   ;;  %s280_s2 = inlined_call_operand.vmem [shape: f32[1,128], index: 2, kind: input, shape index: {}]   ;;  %s281_s3 = inlined_call_operand.vmem [shape: f32[1,128], index: 3, kind: input, shape index: {}]   ;;  %s282_s4 = inlined_call_operand.hbm [shape: f32[8,128], index: 4, kind: output, shape index: {}]  }
   0x1   :  { %10 = vsyncpa [#allocation6], 0 }
   0x2   :  { %11 = vsyncpa [#allocation4], 0  ;;  %s208_s15 = smov [#allocation2]   ;;  %s209_s17 = smov [#allocation5]  }
   0x3   :  { %s18_s16 = sshll.u32 %s208_s15, 4  ;;  %s28_s18 = sshll.u32 %s209_s17, 4  ;;  %s19_s16 = int_to_ptr.vmem [resolvable:$true] %s18_s16  ;;  %s29_s18 = int_to_ptr.vmem [resolvable:$true] %s28_s18 }
   0x4   :  { %s136_s21 = scalar_lea.hbm %s278_s0, 128 }
   0x5   :  { %p137_p0 = scmp.ne.s32.totalorder %s278_s0, %s136_s21  ;;  %p140_p1 = scmp.lt.u32.totalorder %s136_s21, %s278_s0 }
   0x7   :  { %p142_p2 = pnand %p140_p1, %p137_p0 }
   0x9   :  { %145 = shalt.err (!%p142_p2)
}
   0xa   :  { %s146_s26 = scalar_lea.vmem %s19_s16, 128  ;;  %p151_p4 = scmp.lt.s32.totalorder %s19_s16, %s19_s16 }
   0xb   :  { %p147_p3 = scmp.ne.s32.totalorder %s19_s16, %s146_s26  ;;  %p152_p5 = scmp.lt.s32.totalorder %s146_s26, %s146_s26 }
   0xd   :  { %p153_p6 = por %p152_p5, %p151_p4 }
   0xf   :  { %p154_p7 = pnand %p153_p6, %p147_p3 }
  0x11   :  { %157 = shalt.err (!%p154_p7)
}
  0x12   :  { %21 = dma.hbm_to_vmem [thread:$0]  %s278_s0, 128, %s19_s16, [#allocation3]  }
  0x13   :  { %s158_s5 = scalar_lea.hbm %s279_s1, 128 }
  0x14   :  { %p159_p8 = scmp.ne.s32.totalorder %s279_s1, %s158_s5  ;;  %p162_p9 = scmp.lt.u32.totalorder %s158_s5, %s279_s1 }
  0x16   :  { %p164_p10 = pnand %p162_p9, %p159_p8 }
  0x18   :  { %167 = shalt.err (!%p164_p10)
}
  0x19   :  { %s168_s10 = scalar_lea.vmem %s29_s18, 128  ;;  %p173_p12 = scmp.lt.s32.totalorder %s29_s18, %s29_s18 }
  0x1a   :  { %p169_p11 = scmp.ne.s32.totalorder %s29_s18, %s168_s10  ;;  %p174_p13 = scmp.lt.s32.totalorder %s168_s10, %s168_s10 }
  0x1c   :  { %p175_p0 = por %p174_p13, %p173_p12 }
  0x1e   :  { %p176_p1 = pnand %p175_p0, %p169_p11 }
  0x20   :  { %179 = shalt.err (!%p176_p1)
}
  0x21   :  { %31 = dma.hbm_to_vmem [thread:$0]  %s279_s1, 128, %s29_s18, [#allocation6]  }
  0x22   :  { %202 = dma.done.wait [#allocation3], 128  }
  0x23   :  { %203 = vsyncadd [#allocation3], 4294967168 }
  0x24   :  { %204 = dma.done.wait [#allocation6], 128  }
  0x25   :  { %205 = vsyncadd [#allocation6], 4294967168  ;;  %v42_v0 = vld [vmem:[#allocation2] sm:$0xff]  ;;  %v85_v4 = vlaneseq  ;;  %v43_v16 = vld [vmem:[#allocation5] sm:$0xff]  ;;  %s210_s14 = smov [#allocation7]  }
  0x26   :  { %v46_v1 = vand.u32 2147483647, %v42_v0  ;;  %v45_v8 = vld [vmem:[%s281_s3] sm:$0x1]  ;;  %v56_v14 = vsub.f32 0.0, %v42_v0  ;;  %vm53_vm0 = vcmp.ge.f32.partialorder %v42_v0, 0.0 }
  0x27   :  { %v86_v7 = vshrl.u32 %v85_v4, 7  ;;  %v126_v10 = vadd.f32 -1.0, %v45_v8  ;;  %v72_v24 = vsub.f32 1.0, %v43_v16  ;;  %v102_v33 = vand.u32 127, %v85_v4  ;;  %v125_v39 = vld [vmem:[%s280_s2] ss:$0 sm:$0xff] }
  0x28   :  { %v47_v2 = vsub.f32 0.0, %v46_v1  ;;  %v57_v22 = vmax.f32 %v56_v14, 0.0  ;;  %s115_s15 = sshll.u32 %s210_s14, 4  ;;  %s116_s15 = int_to_ptr.vmem [resolvable:$true] %s115_s15 }
  0x29   :  { %v87_v11 = vsub.s32 0, %v86_v7  ;;  %v103_v34 = vmul.u32 128, %v86_v7  ;;  %v92_v36 = vmul.f32 %v72_v24, %v42_v0  ;;  %s180_s16 = scalar_lea.vmem %s116_s15, 128  ;;  %p185_p3 = scmp.lt.s32.totalorder %s116_s15, %s116_s15 }
  0x2a   :  { %v48_v3 = vmul.f32 1.442695, %v47_v2  ;;  %p181_p2 = scmp.ne.s32.totalorder %s116_s15, %s180_s16  ;;  %p186_p4 = scmp.lt.s32.totalorder %s180_s16, %s180_s16 }
  0x2b   :  { %v88_v13 = vrot.slane %v126_v10, %v87_v11  ;;  %v104_v40 = vadd.s32 %v103_v34, %v102_v33 }
  0x2c   :  { %130 = vpow2.f32 %v48_v3  ;;  %p187_p5 = por %p186_p4, %p185_p3 }
  0x2d   :  { %v90_v19 = vmul.f32 %v88_v13, %v43_v16  ;;  %vm105_vm2 = vcmp.lt.s32.totalorder %v104_v40, 256 }
  0x2e   :  { %p188_p6 = pnand %p187_p5, %p181_p2 }
  0x2f   :  { %v91_v29 = vadd.f32 1.0, %v90_v19 }
  0x36   :  { %v131_v5 = vpop.eup %130 }
  0x37   :  { %v50_v6 = vadd.f32 1.0, %v131_v5  ;;  %v61_v9 = vmul.f32 -0.5, %v131_v5  ;;  %v64_v15 = vand.u32 2147483647, %v131_v5 }
  0x39   :  { %132 = vrcp.f32 %v50_v6  ;;  %v62_v12 = vadd.f32 1.0, %v61_v9  ;;  %vm65_vm1 = vcmp.lt.f32.partialorder %v64_v15, 0.0004427343 }
  0x3a   :  { %134 = vlog2.f32 %v50_v6 }
  0x3b   :  { %v63_v18 = vmul.f32 %v131_v5, %v62_v12 }
  0x43   :  { %v133_v17 = vpop.eup %132 }
  0x44   :  { %v135_v20 = vpop.eup %134  ;;  %v54_v21 = vmul.f32 %v133_v17, %v131_v5 }
  0x45   :  { %v60_v23 = vmul.f32 0.6931472, %v135_v20 }
  0x46   :  { %v55_v25 = vsel %vm53_vm0, %v133_v17, %v54_v21 }
  0x47   :  { %v66_v26 = vsel %vm65_vm1, %v63_v18, %v60_v23  ;;  %v68_v27 = vsub.f32 1.0, %v55_v25  ;;  %v71_v28 = vadd.f32 1e-08, %v55_v25 }
  0x48   :  { %v67_v30 = vadd.f32 %v66_v26, %v57_v22 }
  0x49   :  { %v69_v31 = vadd.f32 1e-08, %v68_v27  ;;  %v73_v32 = vmul.f32 %v72_v24, %v71_v28 }
  0x4a   :  { %v93_v37 = vmul.f32 %v91_v29, %v67_v30 }
  0x4b   :  { %v70_v35 = vmul.f32 %v69_v31, %v43_v16 }
  0x4c   :  { %v94_v42 = vadd.f32 %v93_v37, %v92_v36 }
  0x4d   :  { %v74_v38 = vadd.f32 %v73_v32, %v70_v35 }
  0x4f   :  { %v75_v41 = vmul.f32 %v74_v38, %v74_v38 }
  0x51   :  { %v82_v43 = vmul.f32 %v125_v39, %v75_v41 }
  0x53   :  { %v95_v44 = vmul.f32 %v94_v42, %v82_v43 }
  0x55   :  { %v106_v45 = vsel %vm105_vm2, %v95_v44, 0.0 }
  0x56   :  { %108 = vst [vmem:[#allocation7] sm:$0xff] %v106_v45 }
  0x57   :  { %191 = shalt.err (!%p188_p6)
}
  0x58   :  { %s192_s18 = scalar_lea.hbm %s282_s4, 128 }
  0x59   :  { %p193_p7 = scmp.ne.s32.totalorder %s282_s4, %s192_s18  ;;  %p196_p8 = scmp.lt.u32.totalorder %s192_s18, %s282_s4 }
  0x5b   :  { %p198_p9 = pnand %p196_p8, %p193_p7 }
  0x5d   :  { %201 = shalt.err (!%p198_p9)
}
  0x5e   :  { %118 = dma.vmem_to_hbm [thread:$0]  %s116_s15, 128, %s282_s4, [#allocation4]  }
  0x5f   :  { %206 = dma.done.wait [#allocation4], 128  }
  0x60   :  { %207 = vsyncadd [#allocation4], 4294967168 }
  0x61   :  { %122 = vsyncpa [#allocation3], 1 }
  0x62   :  { %123 = vsyncpa [#allocation6], 1 }
  0x63   :  { %124 = vsyncpa [#allocation4], 1 }

</bundles_post_ra>
